<compile_context>
chip_gen: v5e
topology: v5e:2x2
jax: 0.10.0
libtpu: 0.0.40
codegen_flags: <defaults>
</compile_context>

<pallas_src>
import functools

import numpy as np
import jax
import jax.numpy as jnp
from jax import lax
from jax.experimental import pallas as pl
from jax.experimental.pallas import tpu as pltpu


_EPS = 1e-5
_ACT_DTYPE = jnp.bfloat16          # inter-kernel activation storage (halves HBM traffic)


# -----------------------------------------------------------------------------
# capability probes (run tiny kernels once, outside any trace)
# -----------------------------------------------------------------------------
_NATIVE_ERF = None
_BUFFERED1_OK = None
_VMEM_LIMIT = None


def _erf_poly(x):
    # Abramowitz & Stegun 7.1.26 (accurate fallback if lax.erf cannot lower)
    a1, a2, a3, a4, a5 = 0.254829592, -0.284496736, 1.421413741, -1.453152027, 1.061405429
    p = 0.3275911
    s = jnp.where(x >= 0.0, 1.0, -1.0)
    ax = jnp.abs(x)
    t = 1.0 / (1.0 + p * ax)
    poly = ((((a5 * t + a4) * t + a3) * t + a2) * t + a1) * t
    return s * (1.0 - poly * jnp.exp(-ax * ax))


def _erf(x):
    return lax.erf(x) if _NATIVE_ERF else _erf_poly(x)


def _gelu(x):
    return 0.5 * x * (1.0 + _erf(x * 0.7071067811865476))


def _probe_native_erf():
    def k(x_ref, o_ref):
        o_ref[...] = lax.erf(x_ref[...])
    try:
        y = pl.pallas_call(k, out_shape=jax.ShapeDtypeStruct((8, 128), jnp.float32))(
            jnp.ones((8, 128), jnp.float32))
        jax.block_until_ready(y)
        return True
    except Exception:
        return False


def _use_native_erf():
    global _NATIVE_ERF
    if _NATIVE_ERF is None:
        _NATIVE_ERF = _probe_native_erf()
    return _NATIVE_ERF


def _probe_buffered1():
    def k(x_ref, w_ref, o_ref):
        o_ref[...] = x_ref[...] + w_ref[...]
    try:
        wspec = pl.BlockSpec((8, 128), lambda i: (0, 0), pipeline_mode=pl.Buffered(1))
        y = pl.pallas_call(
            k,
            out_shape=jax.ShapeDtypeStruct((16, 128), jnp.float32),
            grid=(2,),
            in_specs=[pl.BlockSpec((8, 128), lambda i: (i, 0)), wspec],
            out_specs=pl.BlockSpec((8, 128), lambda i: (i, 0)),
        )(jnp.zeros((16, 128), jnp.float32), jnp.zeros((8, 128), jnp.float32))
        jax.block_until_ready(y)
        return True
    except Exception:
        return False


def _use_buffered1():
    global _BUFFERED1_OK
    if _BUFFERED1_OK is None:
        _BUFFERED1_OK = _probe_buffered1()
    return _BUFFERED1_OK


def _const_spec(shape, index_map):
    """BlockSpec for a block whose index never changes: single-buffer it if possible."""
    if _use_buffered1():
        try:
            return pl.BlockSpec(shape, index_map, pipeline_mode=pl.Buffered(1))
        except TypeError:
            pass
    return pl.BlockSpec(shape, index_map)


def _vmem_limit():
    global _VMEM_LIMIT
    if _VMEM_LIMIT is None:
        cap = 64 << 20
        try:
            info = pltpu.get_tpu_info()
            cap = int(getattr(info, "vmem_capacity_bytes", cap))
        except Exception:
            pass
        _VMEM_LIMIT = int(min(cap * 3 // 4, 100 << 20))
    return _VMEM_LIMIT


def _cparams(*sem):
    return pltpu.CompilerParams(dimension_semantics=tuple(sem),
                                vmem_limit_bytes=_vmem_limit())


def _row_tile(M, target=512):
    """Largest row tile (<= target, multiple of 8 dividing M) for token-wise kernels."""
    if M <= target:
        return M
    for t in range(target, 7, -8):
        if M % t == 0:
            return t
    return target  # partial last block: Pallas masks the out-of-bounds write


def _hidden_tile(Ch, C, budget=4 << 20):
    """Tile of the MLP hidden dim; bounds bf16 weight bytes streamed per grid step."""
    if 2 * Ch * C * 2 <= budget or Ch % 128 != 0:
        return Ch
    best = 128
    for tc in range(128, Ch, 128):
        if Ch % tc == 0 and 2 * tc * C * 2 <= budget:
            best = tc
    return best


def _pick_wb(Bw, group, N, C, nH):
    """Windows per attention grid step: VMEM-aware, keep >= 2 grid blocks when possible."""
    budget = max(2 << 20, min(_vmem_limit() // 6, 24 << 20))
    per_win = N * 3 * C * 6 + N * N * 16 + N * C * 12   # rough live f32 bytes per window
    cand = [d for d in range(1, min(group, Bw) + 1)
            if group % d == 0 and Bw % d == 0 and d * per_win <= budget]
    if not cand:
        return 1
    multi = [d for d in cand if Bw // d >= 2]            # feed both TCs on v7x
    return max(multi) if multi else max(cand)


# -----------------------------------------------------------------------------
# Fused Pallas kernels
# -----------------------------------------------------------------------------
def _patch_embed_kernel(x_ref, w_ref, b_ref, g_ref, beta_ref, o_ref, *, eps):
    # y = LayerNorm(x @ W + b)  (4x4/s4 conv as matmul, fused with patch_norm)
    y = jnp.dot(x_ref[...].astype(jnp.bfloat16), w_ref[...],
                preferred_element_type=jnp.float32) + b_ref[...]
    mu = jnp.mean(y, axis=-1, keepdims=True)
    yc = y - mu
    var = jnp.mean(yc * yc, axis=-1, keepdims=True)
    o_ref[...] = (yc * lax.rsqrt(var + eps) * g_ref[...] + beta_ref[...]).astype(o_ref.dtype)


def _patch_merge_kernel(x_ref, g_ref, b_ref, w_ref, o_ref, *, eps):
    # y = LayerNorm(x) @ W   (Linear(4C, 2C, bias=False))
    x = x_ref[...].astype(jnp.float32)
    mu = jnp.mean(x, axis=-1, keepdims=True)
    xc = x - mu
    var = jnp.mean(xc * xc, axis=-1, keepdims=True)
    xn = xc * lax.rsqrt(var + eps) * g_ref[...] + b_ref[...]
    o_ref[...] = jnp.dot(xn.astype(jnp.bfloat16), w_ref[...],
                         preferred_element_type=jnp.float32).astype(o_ref.dtype)


def _win_attn_body(xw_ref, g_ref, b_ref, qkvw_ref, qkvb_ref, projw_ref, projb_ref,
                   bias_ref, mask_ref, o_ref, *, num_heads, eps):
    # Fused: LN1 -> QKV (scale pre-folded into q weights) -> per-head softmax
    # attention (+rel bias, +shift mask) -> per-head projection accumulation.
    WB, N, C = xw_ref.shape
    dh = C // num_heads

    x = xw_ref[...].astype(jnp.float32)                      # (WB, N, C)
    mu = jnp.mean(x, axis=-1, keepdims=True)
    xc = x - mu
    var = jnp.mean(xc * xc, axis=-1, keepdims=True)
    xn = xc * lax.rsqrt(var + eps) * g_ref[...] + b_ref[...]

    xm = xn.reshape(WB * N, C).astype(jnp.bfloat16)
    qkv = jnp.dot(xm, qkvw_ref[...], preferred_element_type=jnp.float32) + qkvb_ref[...]
    qkv = qkv.astype(jnp.bfloat16).reshape(WB, N, 3 * C)     # cast once; [q | k | v]

    bias = bias_ref[...].astype(jnp.float32)                 # (nH, N, N), VMEM-resident
    mask = mask_ref[...].astype(jnp.float32) if mask_ref is not None else None

    pw = projw_ref[...]                                      # (C, C) bf16
    acc = jnp.zeros((WB * N, C), jnp.float32)
    for h in range(num_heads):
        qh = qkv[:, :, h * dh:(h + 1) * dh]
        kh = qkv[:, :, C + h * dh:C + (h + 1) * dh]
        vh = qkv[:, :, 2 * C + h * dh:2 * C + (h + 1) * dh]
        s = jnp.einsum("wnd,wmd->wnm", qh, kh, preferred_element_type=jnp.float32)
        s = s + bias[h][None]
        if mask is not None:
            s = s + mask
        s = s - jnp.max(s, axis=-1, keepdims=True)
        p = jnp.exp(s)
        p = p * pl.reciprocal(jnp.sum(p, axis=-1, keepdims=True), approx=True)
        oh = jnp.einsum("wnm,wmd->wnd", p.astype(jnp.bfloat16), vh,
                        preferred_element_type=jnp.float32)
        # accumulate directly through the output projection (no head concat)
        acc = acc + jnp.dot(oh.reshape(WB * N, dh).astype(jnp.bfloat16),
                            pw[h * dh:(h + 1) * dh, :],
                            preferred_element_type=jnp.float32)
    out = acc + projb_ref[...]
    o_ref[...] = out.reshape(WB, N, C).astype(o_ref.dtype)


def _win_attn_kernel_nomask(xw_ref, g_ref, b_ref, qkvw_ref, qkvb_ref, projw_ref,
                            projb_ref, bias_ref, o_ref, *, num_heads, eps):
    _win_attn_body(xw_ref, g_ref, b_ref, qkvw_ref, qkvb_ref, projw_ref, projb_ref,
                   bias_ref, None, o_ref, num_heads=num_heads, eps=eps)


def _win_attn_kernel_mask(xw_ref, g_ref, b_ref, qkvw_ref, qkvb_ref, projw_ref,
                          projb_ref, bias_ref, mask_ref, o_ref, *, num_heads, eps):
    _win_attn_body(xw_ref, g_ref, b_ref, qkvw_ref, qkvb_ref, projw_ref, projb_ref,
                   bias_ref, mask_ref, o_ref, num_heads=num_heads, eps=eps)


def _mlp_block_kernel(x_ref, a_ref, g_ref, b_ref, w1_ref, b1_ref, w2_ref, b2_ref,
                      o_ref, acc_ref, xn_ref, *, eps):
    # Fused: x = shortcut + attn; out = x + fc2(GELU(fc1(LN2(x))))
    # The hidden dim is tiled over grid axis 1 ("arbitrary"); fc2 partial sums
    # accumulate into acc_ref, LN2(x) is computed once into xn_ref.
    j = pl.program_id(1)

    @pl.when(j == 0)
    def _():
        x = x_ref[...].astype(jnp.float32) + a_ref[...].astype(jnp.float32)
        mu = jnp.mean(x, axis=-1, keepdims=True)
        xc = x - mu
        var = jnp.mean(xc * xc, axis=-1, keepdims=True)
        xn = xc * lax.rsqrt(var + eps) * g_ref[...] + b_ref[...]
        xn_ref[...] = xn.astype(jnp.bfloat16)
        acc_ref[...] = x + b2_ref[...]                       # residual + fc2 bias

    h = jnp.dot(xn_ref[...], w1_ref[...], preferred_element_type=jnp.float32) + b1_ref[...]
    h = _gelu(h)
    acc_ref[...] += jnp.dot(h.astype(jnp.bfloat16), w2_ref[...],
                            preferred_element_type=jnp.float32)

    @pl.when(j == pl.num_programs(1) - 1)
    def _():
        o_ref[...] = acc_ref[...].astype(o_ref.dtype)


# -----------------------------------------------------------------------------
# pallas_call wrappers
# -----------------------------------------------------------------------------
def patch_embed(x_nchw, p, patch_size):
    B, Cin, H, W = x_nchw.shape
    Ph, Pw = H // patch_size, W // patch_size
    xp = x_nchw.reshape(B, Cin, Ph, patch_size, Pw, patch_size)
    xp = xp.transpose(0, 2, 4, 1, 3, 5).reshape(B * Ph * Pw, Cin * patch_size * patch_size)
    M, K = xp.shape
    E = p["proj_w"].shape[1]
    tm = _row_tile(M)
    y = pl.pallas_call(
        functools.partial(_patch_embed_kernel, eps=_EPS),
        out_shape=jax.ShapeDtypeStruct((M, E), _ACT_DTYPE),
        grid=(pl.cdiv(M, tm),),
        in_specs=[
            pl.BlockSpec((tm, K), lambda i: (i, 0)),
            _const_spec((K, E), lambda i: (0, 0)),
            _const_spec((1, E), lambda i: (0, 0)),
            _const_spec((1, E), lambda i: (0, 0)),
            _const_spec((1, E), lambda i: (0, 0)),
        ],
        out_specs=pl.BlockSpec((tm, E), lambda i: (i, 0)),
        compiler_params=_cparams("parallel"),
    )(xp, p["proj_w"], p["proj_b"].reshape(1, E),
      p["norm_g"].reshape(1, E), p["norm_b"].reshape(1, E))
    return y.reshape(B, Ph * Pw, E), Ph, Pw


def fused_window_attention(xw, ln_g, ln_b, qkv_w, qkv_b, proj_w, proj_b,
                           rel_bias, attn_mask, num_heads):
    """xw: (Bw, N, C) raw (pre-LN) windowed tokens -> (Bw, N, C)."""
    Bw, N, C = xw.shape
    nH = num_heads
    group = attn_mask.shape[0] if attn_mask is not None else Bw
    WB = _pick_wb(Bw, group, N, C, nH)
    nblk = Bw // WB

    in_specs = [
        pl.BlockSpec((WB, N, C), lambda i: (i, 0, 0)),       # windows
        _const_spec((1, C), lambda i: (0, 0)),               # norm1 gamma
        _const_spec((1, C), lambda i: (0, 0)),               # norm1 beta
        _const_spec((C, 3 * C), lambda i: (0, 0)),           # qkv weight (resident)
        _const_spec((1, 3 * C), lambda i: (0, 0)),           # qkv bias
        _const_spec((C, C), lambda i: (0, 0)),               # proj weight (resident)
        _const_spec((1, C), lambda i: (0, 0)),               # proj bias
        _const_spec((nH, N, N), lambda i: (0, 0, 0)),        # rel-pos bias (resident)
    ]
    args = [xw, ln_g.reshape(1, C), ln_b.reshape(1, C), qkv_w, qkv_b.reshape(1, 3 * C),
            proj_w, proj_b.reshape(1, C), rel_bias]

    if attn_mask is not None:
        # NOTE: correctness of i % n_mask_blk relies on WB dividing both nW and
        # Bw, and on windows being batch-major (enforced by _pick_wb / take-perm).
        n_mask_blk = group // WB
        if n_mask_blk == 1:
            in_specs.append(_const_spec((WB, N, N), lambda i: (0, 0, 0)))
        else:
            in_specs.append(pl.BlockSpec((WB, N, N), lambda i: (i % n_mask_blk, 0, 0)))
        args.append(attn_mask)
        kernel = functools.partial(_win_attn_kernel_mask, num_heads=nH, eps=_EPS)
    else:
        kernel = functools.partial(_win_attn_kernel_nomask, num_heads=nH, eps=_EPS)

    return pl.pallas_call(
        kernel,
        out_shape=jax.ShapeDtypeStruct((Bw, N, C), _ACT_DTYPE),
        grid=(nblk,),
        in_specs=in_specs,
        out_specs=pl.BlockSpec((WB, N, C), lambda i: (i, 0, 0)),
        compiler_params=_cparams("parallel"),
    )(*args)


def fused_mlp_block(x, attn, g, b, w1, b1, w2, b2):
    M, C = x.shape
    Ch = w1.shape[1]
    tm = _row_tile(M)
    tc = _hidden_tile(Ch, C)
    return pl.pallas_call(
        functools.partial(_mlp_block_kernel, eps=_EPS),
        out_shape=jax.ShapeDtypeStruct((M, C), _ACT_DTYPE),
        grid=(pl.cdiv(M, tm), Ch // tc),
        in_specs=[
            pl.BlockSpec((tm, C), lambda i, j: (i, 0)),      # shortcut (revisited over j)
            pl.BlockSpec((tm, C), lambda i, j: (i, 0)),      # attention branch
            _const_spec((1, C), lambda i, j: (0, 0)),        # norm2 gamma
            _const_spec((1, C), lambda i, j: (0, 0)),        # norm2 beta
            pl.BlockSpec((C, tc), lambda i, j: (0, j)),      # fc1 weight slice (streamed)
            pl.BlockSpec((1, tc), lambda i, j: (0, j)),      # fc1 bias slice
            pl.BlockSpec((tc, C), lambda i, j: (j, 0)),      # fc2 weight slice (streamed)
            _const_spec((1, C), lambda i, j: (0, 0)),        # fc2 bias
        ],
        out_specs=pl.BlockSpec((tm, C), lambda i, j: (i, 0)),
        scratch_shapes=[pltpu.VMEM((tm, C), jnp.float32),    # fc2 accumulator (+residual)
                        pltpu.VMEM((tm, C), jnp.bfloat16)],  # LN2(x) reused across j
        compiler_params=_cparams("parallel", "arbitrary"),
    )(x, attn, g.reshape(1, C), b.reshape(1, C), w1, b1.reshape(1, Ch), w2, b2.reshape(1, C))


def patch_merging(x, p, H, W):
    B, L, C = x.shape
    xh = x.reshape(B, H, W, C)
    x0 = xh[:, 0::2, 0::2, :]
    x1 = xh[:, 1::2, 0::2, :]
    x2 = xh[:, 0::2, 1::2, :]
    x3 = xh[:, 1::2, 1::2, :]
    xc = jnp.concatenate([x0, x1, x2, x3], axis=-1).reshape(B * (H // 2) * (W // 2), 4 * C)
    M = xc.shape[0]
    tm = _row_tile(M)
    out = pl.pallas_call(
        functools.partial(_patch_merge_kernel, eps=_EPS),
        out_shape=jax.ShapeDtypeStruct((M, 2 * C), _ACT_DTYPE),
        grid=(pl.cdiv(M, tm),),
        in_specs=[
            pl.BlockSpec((tm, 4 * C), lambda i: (i, 0)),
            _const_spec((1, 4 * C), lambda i: (0, 0)),
            _const_spec((1, 4 * C), lambda i: (0, 0)),
            _const_spec((4 * C, 2 * C), lambda i: (0, 0)),
        ],
        out_specs=pl.BlockSpec((tm, 2 * C), lambda i: (i, 0)),
        compiler_params=_cparams("parallel"),
    )(xc, p["norm_g"].reshape(1, 4 * C), p["norm_b"].reshape(1, 4 * C), p["red_w"])
    return out.reshape(B, (H // 2) * (W // 2), 2 * C)


# -----------------------------------------------------------------------------
# static tables (host / init side)
# -----------------------------------------------------------------------------
def relative_position_index(ws):
    coords = np.stack(np.meshgrid(np.arange(ws), np.arange(ws), indexing="ij"))
    cf = coords.reshape(2, -1)
    rel = cf[:, :, None] - cf[:, None, :]
    rel = rel.transpose(1, 2, 0).astype(np.int64)
    rel[:, :, 0] += ws - 1
    rel[:, :, 1] += ws - 1
    rel[:, :, 0] *= 2 * ws - 1
    return rel.sum(-1)                                       # (ws*ws, ws*ws)


def shifted_window_attn_mask(H, W, ws, shift):
    img_mask = np.zeros((1, H, W, 1), np.float32)
    slices = (slice(0, -ws), slice(-ws, -shift), slice(-shift, None))
    cnt = 0
    for h in slices:
        for w in slices:
            img_mask[:, h, w, :] = cnt
            cnt += 1
    mw = (img_mask.reshape(1, H // ws, ws, W // ws, ws, 1)
          .transpose(0, 1, 3, 2, 4, 5).reshape(-1, ws * ws))
    am = mw[:, None, :] - mw[:, :, None]
    return np.where(am != 0, -100.0, 0.0).astype(np.float32)  # (nW, N, N)


def window_perms(H, W, ws, shift):
    """Static token permutation folding cyclic shift + window partition (and inverse)."""
    idx = np.arange(H * W, dtype=np.int32).reshape(H, W)
    if shift > 0:
        idx = np.roll(idx, (-shift, -shift), axis=(0, 1))
    perm = (idx.reshape(H // ws, ws, W // ws, ws)
            .transpose(0, 2, 1, 3).reshape(-1).astype(np.int32))
    inv = np.argsort(perm).astype(np.int32)
    return jnp.asarray(perm), jnp.asarray(inv)


# -----------------------------------------------------------------------------
# forward
# -----------------------------------------------------------------------------
def swin_block(x, p, m, H, W):
    B, L, C = x.shape
    ws = m["window_size"]
    N = ws * ws
    # LN1 commutes with the permutation, so it is fused into the attention kernel;
    # shift + window partition are one static gather over the token axis.
    xw = jnp.take(x, m["perm"], axis=1).reshape(-1, N, C)     # (B*nW, N, C)
    yw = fused_window_attention(
        xw, p["norm1_g"], p["norm1_b"], p["qkv_w"], p["qkv_b"],
        p["proj_w"], p["proj_b"], p["rel_bias"], m["attn_mask"], m["num_heads"])
    attn = jnp.take(yw.reshape(B, L, C), m["inv_perm"], axis=1).reshape(B * L, C)
    out = fused_mlp_block(x.reshape(B * L, C), attn,
                          p["norm2_g"], p["norm2_b"],
                          p["fc1_w"], p["fc1_b"], p["fc2_w"], p["fc2_b"])
    return out.reshape(B, L, C)


def swin_encoder_forward(x_nchw, params, meta, patch_size):
    _use_native_erf()          # probes run once, before any kernel trace
    _use_buffered1()
    x, Ph, Pw = patch_embed(x_nchw, params["patch_embed"], patch_size)
    # pos_drop: identity at inference
    H, W = Ph, Pw
    n_layers = len(params["layers"])
    for li in range(n_layers):
        lp, lm = params["layers"][li], meta["layers"][li]
        for d in range(len(lp["blocks"])):
            x = swin_block(x, lp["blocks"][d], lm["blocks"][d], H, W)
        if li < n_layers - 1:                                # PatchMerging except last stage
            x = patch_merging(x, lp["downsample"], H, W)
            H, W = H // 2, W // 2
    return x.astype(jnp.float32)                             # model.norm is None in Donut


# -----------------------------------------------------------------------------
# deterministic parameter construction (synthetic weights, same shapes as timm Swin)
# -----------------------------------------------------------------------------
def init_swin_encoder(key, *, input_size, in_chans, patch_size, embed_dim,
                      depths, num_heads, window_size):
    keys = iter(jax.random.split(key, 4096))

    def nrm(shape):
        return 0.02 * jax.random.normal(next(keys), shape, jnp.float32)

    bf16 = lambda a: a.astype(jnp.bfloat16)
    zeros = lambda s: jnp.zeros(s, jnp.float32)
    ones = lambda s: jnp.ones(s, jnp.float32)

    H, W = input_size
    Ph, Pw = H // patch_size, W // patch_size
    params = {
        "patch_embed": {
            "proj_w": bf16(nrm((in_chans * patch_size * patch_size, embed_dim))),
            "proj_b": zeros((embed_dim,)),
            "norm_g": ones((embed_dim,)),
            "norm_b": zeros((embed_dim,)),
        },
        "layers": [],
    }
    meta = {"layers": []}
    res, dim = (Ph, Pw), embed_dim
    for li, depth in enumerate(depths):
        nH = num_heads[li]
        layer_p, layer_m = {"blocks": []}, {"blocks": []}
        for d in range(depth):
            ws = window_size
            shift = 0 if d % 2 == 0 else window_size // 2
            if min(res) <= ws:                               # timm SwinTransformerBlock rule
                shift, ws = 0, min(res)
            N = ws * ws
            scale = (dim // nH) ** (-0.5)
            # relative-position bias (nH, N, N), precomputed once host-side
            table = nrm(((2 * ws - 1) ** 2, nH))
            idx = jnp.asarray(relative_position_index(ws).reshape(-1))
            rel_bias = jnp.transpose(jnp.take(table, idx, axis=0).reshape(N, N, nH),
                                     (2, 0, 1)).astype(jnp.float32)
            # fold the attention scale into the q columns of qkv (checkpoint loaders
            # must apply the same fold)
            qkv_w = nrm((dim, 3 * dim))
            qkv_w = qkv_w.at[:, :dim].multiply(scale)
            qkv_b = zeros((3 * dim,)).at[:dim].multiply(scale)
            perm, inv_perm = window_perms(res[0], res[1], ws, shift)
            layer_p["blocks"].append({
                "norm1_g": ones((dim,)), "norm1_b": zeros((dim,)),
                "qkv_w": bf16(qkv_w), "qkv_b": qkv_b,
                "rel_bias": rel_bias,
                "proj_w": bf16(nrm((dim, dim))), "proj_b": zeros((dim,)),
                "norm2_g": ones((dim,)), "norm2_b": zeros((dim,)),
                "fc1_w": bf16(nrm((dim, 4 * dim))), "fc1_b": zeros((4 * dim,)),
                "fc2_w": bf16(nrm((4 * dim, dim))), "fc2_b": zeros((dim,)),
            })
            layer_m["blocks"].append({
                "num_heads": nH, "window_size": ws, "shift_size": shift,
                "perm": perm, "inv_perm": inv_perm,
                "attn_mask": (jnp.asarray(
                    shifted_window_attn_mask(res[0], res[1], ws, shift)).astype(jnp.bfloat16)
                    if shift > 0 else None),
            })
        if li < len(depths) - 1:
            layer_p["downsample"] = {
                "norm_g": ones((4 * dim,)), "norm_b": zeros((4 * dim,)),
                "red_w": bf16(nrm((4 * dim, 2 * dim))),
            }
        params["layers"].append(layer_p)
        meta["layers"].append(layer_m)
        if li < len(depths) - 1:
            res, dim = (res[0] // 2, res[1] // 2), dim * 2
    return params, meta


# -----------------------------------------------------------------------------
if __name__ == "__main__":
    _use_native_erf()
    _use_buffered1()

    # small config consistent with the module structure (scaled-down Swin):
    B, in_chans, H, W = 2, 3, 32, 32
    cfg = dict(input_size=(H, W), in_chans=in_chans, patch_size=4, embed_dim=16,
               depths=(2, 2), num_heads=(2, 4), window_size=4)

    params, meta = init_swin_encoder(jax.random.PRNGKey(42), **cfg)
    x = jax.random.normal(jax.random.PRNGKey(0), (B, in_chans, H, W), jnp.float32)

    out = swin_encoder_forward(x, params, meta, cfg["patch_size"])
    out = jax.block_until_ready(out)

    # expected output: (B, (H/4/2)*(W/4/2), embed_dim * 2^(num_stages-1))
    expected = (B, (H // 8) * (W // 8), cfg["embed_dim"] * 2)
    assert out.shape == expected, (out.shape, expected)
    assert bool(jnp.all(jnp.isfinite(out)))
    print("KERNEL_OK")
</pallas_src>

<mosaic_0001>
module attributes {stable_mosaic.version = 11 : i64} {
  func.func @k(%arg0: memref<8x128xf32, #tpu.memory_space<vmem>>, %arg1: memref<8x128xf32, #tpu.memory_space<vmem>>) attributes {dimension_semantics = [], scalar_prefetch = 0 : i64, scratch_operands = 0 : i64, tpu.core_type = #tpu.core_type<tc>} {
    %c0 = arith.constant 0 : index
    %c0_0 = arith.constant 0 : index
    %0 = vector.load %arg0[%c0, %c0_0] : memref<8x128xf32, #tpu.memory_space<vmem>>, vector<8x128xf32>
    %1 = math.erf %0 : vector<8x128xf32>
    %c0_1 = arith.constant 0 : index
    %c0_2 = arith.constant 0 : index
    %2 = vector.load %arg1[%c0_1, %c0_2] : memref<8x128xf32, #tpu.memory_space<vmem>>, vector<8x128xf32>
    tpu.vector_store %arg1[%c0_1, %c0_2], %1 {strides = array<i32>} : memref<8x128xf32, #tpu.memory_space<vmem>>, vector<8x128xf32>,
    return
  }
}

module attributes {stable_mosaic.version = 11 : i64} {
  func.func @k(%arg0: i32, %arg1: memref<8x128xf32, #tpu.memory_space<vmem>>, %arg2: memref<8x128xf32, #tpu.memory_space<vmem>>, %arg3: memref<8x128xf32, #tpu.memory_space<vmem>>) attributes {dimension_semantics = [#tpu.dimension_semantics<arbitrary>], iteration_bounds = array<i64: 2>, scalar_prefetch = 0 : i64, scratch_operands = 0 : i64, tpu.core_type = #tpu.core_type<tc>, window_params = [{transform_indices = @transform_0, window_bounds = array<i64: 8, 128>}, {pipeline_mode = #tpu.pipeline_mode<synchronous>, transform_indices = @transform_1, window_bounds = array<i64: 8, 128>}, {transform_indices = @transform_2, window_bounds = array<i64: 8, 128>}]} {
    %c0 = arith.constant 0 : index
    %c0_0 = arith.constant 0 : index
    %0 = vector.load %arg1[%c0, %c0_0] : memref<8x128xf32, #tpu.memory_space<vmem>>, vector<8x128xf32>
    %c0_1 = arith.constant 0 : index
    %c0_2 = arith.constant 0 : index
    %1 = vector.load %arg2[%c0_1, %c0_2] : memref<8x128xf32, #tpu.memory_space<vmem>>, vector<8x128xf32>
    %2 = arith.addf %0, %1 : vector<8x128xf32>
    %c0_3 = arith.constant 0 : index
    %c0_4 = arith.constant 0 : index
    %3 = vector.load %arg3[%c0_3, %c0_4] : memref<8x128xf32, #tpu.memory_space<vmem>>, vector<8x128xf32>
    tpu.vector_store %arg3[%c0_3, %c0_4], %2 {strides = array<i32>} : memref<8x128xf32, #tpu.memory_space<vmem>>, vector<8x128xf32>,
    return
  }
  func.func @transform_0(%arg0: i32) -> (i32, i32) {
    %c0_i32 = arith.constant 0 : i32
    %c0_i32_0 = arith.constant 0 : i32
    return %arg0, %c0_i32 : i32, i32
  }
  func.func @transform_1(%arg0: i32) -> (i32, i32) {
    %c0_i32 = arith.constant 0 : i32
    %c0_i32_0 = arith.constant 0 : i32
    %c0_i32_1 = arith.constant 0 : i32
    return %c0_i32, %c0_i32_0 : i32, i32
  }
  func.func @transform_2(%arg0: i32) -> (i32, i32) {
    %c0_i32 = arith.constant 0 : i32
    %c0_i32_0 = arith.constant 0 : i32
    return %arg0, %c0_i32 : i32, i32
  }
}

module attributes {stable_mosaic.version = 11 : i64} {
  func.func @_patch_embed_kernel(%arg0: i32, %arg1: memref<128x48xf32, #tpu.memory_space<vmem>>, %arg2: memref<48x16xbf16, #tpu.memory_space<vmem>>, %arg3: memref<1x16xf32, #tpu.memory_space<vmem>>, %arg4: memref<1x16xf32, #tpu.memory_space<vmem>>, %arg5: memref<1x16xf32, #tpu.memory_space<vmem>>, %arg6: memref<128x16xbf16, #tpu.memory_space<vmem>>) attributes {dimension_semantics = [#tpu.dimension_semantics<parallel>], iteration_bounds = array<i64: 1>, scalar_prefetch = 0 : i64, scratch_operands = 0 : i64, tpu.core_type = #tpu.core_type<tc>, window_params = [{transform_indices = @transform_0, window_bounds = array<i64: 128, 48>}, {pipeline_mode = #tpu.pipeline_mode<synchronous>, transform_indices = @transform_1, window_bounds = array<i64: 48, 16>}, {pipeline_mode = #tpu.pipeline_mode<synchronous>, transform_indices = @transform_2, window_bounds = array<i64: 1, 16>}, {pipeline_mode = #tpu.pipeline_mode<synchronous>, transform_indices = @transform_3, window_bounds = array<i64: 1, 16>}, {pipeline_mode = #tpu.pipeline_mode<synchronous>, transform_indices = @transform_4, window_bounds = array<i64: 1, 16>}, {transform_indices = @transform_5, window_bounds = array<i64: 128, 16>}]} {
    %c0 = arith.constant 0 : index
    %c0_0 = arith.constant 0 : index
    %0 = vector.load %arg1[%c0, %c0_0] : memref<128x48xf32, #tpu.memory_space<vmem>>, vector<128x48xf32>
    %1 = arith.truncf %0 : vector<128x48xf32> to vector<128x48xbf16>
    %c0_1 = arith.constant 0 : index
    %c0_2 = arith.constant 0 : index
    %2 = vector.load %arg2[%c0_1, %c0_2] : memref<48x16xbf16, #tpu.memory_space<vmem>>, vector<48x16xbf16>
    %cst = arith.constant dense<0.000000e+00> : vector<128x16xf32>
    %3 = tpu.matmul %1, %2, %cst {dimension_numbers = #tpu.dot_dimension_numbers<[1], [0], [0], [1], [0, 0, 1, 1], [], []>} : vector<128x48xbf16>, vector<48x16xbf16>, vector<128x16xf32> -> vector<128x16xf32>
    %c0_3 = arith.constant 0 : index
    %c0_4 = arith.constant 0 : index
    %4 = vector.load %arg3[%c0_3, %c0_4] : memref<1x16xf32, #tpu.memory_space<vmem>>, vector<1x16xf32>
    %5 = vector.broadcast %4 : vector<1x16xf32> to vector<128x16xf32>
    %6 = arith.addf %3, %5 : vector<128x16xf32>
    %cst_5 = arith.constant dense<0.000000e+00> : vector<128xf32>
    %7 = vector.multi_reduction <add>, %6, %cst_5 [1] : vector<128x16xf32> to vector<128xf32>
    %8 = vector.shape_cast %7 : vector<128xf32> to vector<128x1xf32>
    %cst_6 = arith.constant 1.600000e+01 : f32
    %9 = vector.broadcast %cst_6 : f32 to vector<128x1xf32>
    %10 = arith.divf %8, %9 : vector<128x1xf32>
    %11 = vector.broadcast %10 : vector<128x1xf32> to vector<128x16xf32>
    %12 = arith.subf %6, %11 : vector<128x16xf32>
    %13 = arith.mulf %12, %12 : vector<128x16xf32>
    %cst_7 = arith.constant dense<0.000000e+00> : vector<128xf32>
    %14 = vector.multi_reduction <add>, %13, %cst_7 [1] : vector<128x16xf32> to vector<128xf32>
    %15 = vector.shape_cast %14 : vector<128xf32> to vector<128x1xf32>
    %cst_8 = arith.constant 1.600000e+01 : f32
    %16 = vector.broadcast %cst_8 : f32 to vector<128x1xf32>
    %17 = arith.divf %15, %16 : vector<128x1xf32>
    %cst_9 = arith.constant 9.99999974E-6 : f32
    %18 = vector.broadcast %cst_9 : f32 to vector<128x1xf32>
    %19 = arith.addf %17, %18 : vector<128x1xf32>
    %20 = math.rsqrt %19 : vector<128x1xf32>
    %21 = vector.broadcast %20 : vector<128x1xf32> to vector<128x16xf32>
    %22 = arith.mulf %12, %21 : vector<128x16xf32>
    %c0_10 = arith.constant 0 : index
    %c0_11 = arith.constant 0 : index
    %23 = vector.load %arg4[%c0_10, %c0_11] : memref<1x16xf32, #tpu.memory_space<vmem>>, vector<1x16xf32>
    %24 = vector.broadcast %23 : vector<1x16xf32> to vector<128x16xf32>
    %25 = arith.mulf %22, %24 : vector<128x16xf32>
    %c0_12 = arith.constant 0 : index
    %c0_13 = arith.constant 0 : index
    %26 = vector.load %arg5[%c0_12, %c0_13] : memref<1x16xf32, #tpu.memory_space<vmem>>, vector<1x16xf32>
    %27 = vector.broadcast %26 : vector<1x16xf32> to vector<128x16xf32>
    %28 = arith.addf %25, %27 : vector<128x16xf32>
    %29 = arith.truncf %28 : vector<128x16xf32> to vector<128x16xbf16>
    %c0_14 = arith.constant 0 : index
    %c0_15 = arith.constant 0 : index
    %30 = vector.load %arg6[%c0_14, %c0_15] : memref<128x16xbf16, #tpu.memory_space<vmem>>, vector<128x16xbf16>
    tpu.vector_store %arg6[%c0_14, %c0_15], %29 {strides = array<i32>} : memref<128x16xbf16, #tpu.memory_space<vmem>>, vector<128x16xbf16>,
    return
  }
  func.func @transform_0(%arg0: i32) -> (i32, i32) {
    %c0_i32 = arith.constant 0 : i32
    %c0_i32_0 = arith.constant 0 : i32
    return %arg0, %c0_i32 : i32, i32
  }
  func.func @transform_1(%arg0: i32) -> (i32, i32) {
    %c0_i32 = arith.constant 0 : i32
    %c0_i32_0 = arith.constant 0 : i32
    %c0_i32_1 = arith.constant 0 : i32
    return %c0_i32, %c0_i32_0 : i32, i32
  }
  func.func @transform_2(%arg0: i32) -> (i32, i32) {
    %c0_i32 = arith.constant 0 : i32
    %c0_i32_0 = arith.constant 0 : i32
    %c0_i32_1 = arith.constant 0 : i32
    return %c0_i32, %c0_i32_0 : i32, i32
  }
  func.func @transform_3(%arg0: i32) -> (i32, i32) {
    %c0_i32 = arith.constant 0 : i32
    %c0_i32_0 = arith.constant 0 : i32
    %c0_i32_1 = arith.constant 0 : i32
    return %c0_i32, %c0_i32_0 : i32, i32
  }
  func.func @transform_4(%arg0: i32) -> (i32, i32) {
    %c0_i32 = arith.constant 0 : i32
    %c0_i32_0 = arith.constant 0 : i32
    %c0_i32_1 = arith.constant 0 : i32
    return %c0_i32, %c0_i32_0 : i32, i32
  }
  func.func @transform_5(%arg0: i32) -> (i32, i32) {
    %c0_i32 = arith.constant 0 : i32
    %c0_i32_0 = arith.constant 0 : i32
    return %arg0, %c0_i32 : i32, i32
  }
}

</mosaic_0001>

<bundles_post_ra>
// kernel: tpu_custom_call.1
= control target key start
LH: loop header
LB: loop body
LE: loop exit
PB: predicated region body
PF: predicated region fallthrough
CT: control target
= control target key end

     0   :  { %6 = vsyncpa [#allocation3], 0  ;;  %s157_s0 = inlined_call_operand.hbm [shape: f32[8,128], index: 0, kind: input, shape index: {}]   ;;  %s158_s1 = inlined_call_operand.hbm [shape: f32[8,128], index: 1, kind: output, shape index: {}]  }
   0x1   :  { %7 = vsyncpa [#allocation4], 0  ;;  %s13_s8 = sshll.u32 %s157_s0, 4  ;;  %s139_s9 = smov [#allocation2]   ;;  %s14_s8 = int_to_ptr.hbm [resolvable:$true] %s13_s8 }
   0x2   :  { %s15_s10 = sshll.u32 %s139_s9, 4  ;;  %s16_s10 = int_to_ptr.vmem [resolvable:$true] %s15_s10 }
   0x3   :  { %18 = dma.hbm_to_vmem [thread:$0]  %s14_s8, 128, %s16_s10, [#allocation3]  }
   0x4   :  { %135 = dma.done.wait [#allocation3], 128  }
   0x5   :  { %136 = vsyncadd [#allocation3], 4294967168  ;;  %v23_v0 = vld [vmem:[#allocation2] sm:$0xff]  ;;  %s140_s0 = smov [#allocation5]   ;;  %s72_s14 = sshll.u32 %s158_s1, 4  ;;  %s73_s14 = int_to_ptr.hbm [resolvable:$true] %s72_s14 }
   0x6   :  { %v24_v1 = vmul.f32 %v23_v0, %v23_v0  ;;  %s70_s11 = sshll.u32 %s140_s0, 4  ;;  %s71_s11 = int_to_ptr.vmem [resolvable:$true] %s70_s11 }
   0x8   :  { %v25_v2 = vmin.f32 %v24_v1, 16.0 }
   0xa   :  { %v26_v3 = vmul.f32 2.1237322e-06, %v25_v2  ;;  %v37_v4 = vmul.f32 3.8918573e-05, %v25_v2 }
   0xc   :  { %v27_v5 = vadd.f32 0.00028619796, %v26_v3  ;;  %v38_v6 = vadd.f32 0.001143296, %v37_v4 }
   0xe   :  { %v28_v7 = vmul.f32 %v27_v5, %v25_v2  ;;  %v39_v8 = vmul.f32 %v38_v6, %v25_v2 }
  0x10   :  { %v29_v9 = vadd.f32 0.0036580483, %v28_v7  ;;  %v40_v10 = vadd.f32 0.014752088, %v39_v8 }
  0x12   :  { %v30_v11 = vmul.f32 %v29_v9, %v25_v2  ;;  %v41_v12 = vmul.f32 %v40_v10, %v25_v2 }
  0x14   :  { %v42_v13 = vadd.f32 0.112945676, %v41_v12  ;;  %v31_v14 = vadd.f32 0.05243302, %v30_v11 }
  0x16   :  { %v43_v15 = vmul.f32 %v42_v13, %v25_v2  ;;  %v32_v17 = vmul.f32 %v31_v14, %v25_v2 }
  0x18   :  { %v44_v16 = vadd.f32 0.4994258, %v43_v15  ;;  %v33_v20 = vadd.f32 0.18741608, %v32_v17 }
  0x1a   :  { %v45_v18 = vmul.f32 %v44_v16, %v25_v2  ;;  %v34_v21 = vmul.f32 %v33_v20, %v25_v2 }
  0x1c   :  { %v46_v19 = vadd.f32 1.0, %v45_v18  ;;  %v35_v24 = vadd.f32 1.1283791, %v34_v21 }
  0x1e   :  { %85 = vrcp.f32 %v46_v19  ;;  %v58_v25 = vand.u32 2147483648, %v46_v19  ;;  %vm52_vm0 = vweird.f32 %v46_v19  ;;  %v56_v27 = vand.u32 2147483647, %v46_v19 }
  0x1f   :  { %v36_v30 = vmul.f32 %v35_v24, %v23_v0 }
  0x20   :  { %v59_v29 = vor.u32 1.1754944e-38, %v58_v25  ;;  %vm57_vm3 = vcmp.eq.f32.partialorder %v56_v27, 8.507059e+37 }
  0x24   :  { %v86_v22 = vpop.eup %85 }
  0x25   :  { %v48_v23 = vmul.f32 %v86_v22, %v46_v19  ;;  %vm53_vm1 = vweird.f32 %v86_v22 }
  0x26   :  { %vm54_vm2 = vmor %vm52_vm0, %vm53_vm1 }
  0x27   :  { %v49_v26 = vsub.f32 1.0, %v48_v23 }
  0x29   :  { %v50_v28 = vmul.f32 %v86_v22, %v49_v26 }
  0x2b   :  { %v51_v31 = vadd.f32 %v86_v22, %v50_v28 }
  0x2d   :  { %v55_v32 = vsel %vm54_vm2, %v86_v22, %v51_v31 }
  0x2e   :  { %v60_v33 = vsel %vm57_vm3, %v59_v29, %v55_v32 }
  0x2f   :  { %v61_v34 = vmul.f32 %v60_v33, %v36_v30 }
  0x31   :  { %v82_v35 = vclamps-f32 %v61_v34, 1.0 }
  0x33   :  { %64 = vst [vmem:[#allocation5] sm:$0xff] %v82_v35 }
  0x34   :  { %75 = dma.vmem_to_hbm [thread:$0]  %s71_s11, 128, %s73_s14, [#allocation4]  }
  0x35   :  { %137 = dma.done.wait [#allocation4], 128  }
  0x36   :  { %138 = vsyncadd [#allocation4], 4294967168 }
  0x37   :  { %80 = vsyncpa [#allocation3], 1 }
  0x38   :  { %81 = vsyncpa [#allocation4], 1 }

// kernel: tpu_custom_call.1
= control target key start
LH: loop header
LB: loop body
LE: loop exit
PB: predicated region body
PF: predicated region fallthrough
CT: control target
= control target key end

     0   :  { %7 = vsyncpa [#allocation3], 0  ;;  %s633_s0 = inlined_call_operand.hbm [shape: f32[16,128], index: 0, kind: input, shape index: {}]   ;;  %s634_s1 = inlined_call_operand.hbm [shape: f32[8,128], index: 1, kind: input, shape index: {}]   ;;  %s635_s2 = inlined_call_operand.hbm [shape: f32[16,128], index: 2, kind: output, shape index: {}]  }
   0x1   :  { %9 = vsyncpa [#allocation3 + $0x1], 0 }
   0x2   :  { %10 = vsyncpa [#allocation6], 0 }
   0x3   :  { %11 = vsyncpa [#allocation4], 0 }
   0x4   :  { %13 = vsyncpa [#allocation4 + $0x1], 0  ;;  %s495_s9 = smov 0   ;;  %s497_s10 = smov 0  }
   0x5   :  { %s499_s11 = smov 0   ;;  %s501_s12 = smov 0  }
   0x6 LB: > { %s516_s13 = sadd.s32 4294967295, %s477_s12   ;;  %s276_s14 = sadd.s32 4294967294, %s477_s12   ;;  %s477_s12 = sphi %s501_s12, %s645_s12   ;;  %s473_s11 = sphi %s499_s11, %s644_s11   ;;  %s469_s10 = sphi %s497_s10, %s643_s10   ;;  %s465_s9 = sphi %s495_s9, %s642_s9  }
   0x7   : > { %p39_p0 = scmp.ne.s32.totalorder %s469_s10, %s465_s9  ;;  %p40_p1 = scmp.eq.s32.totalorder %s516_s13, 0 }
   0x8   : > { %p84_p2 = scmp.eq.s32.totalorder %s516_s13, 1  ;;  %p90_p3 = scmp.eq.s32.totalorder %s276_s14, 1 }
   0x9   : > { %p525_p4 = por %p40_p1, %p39_p0  ;;  %p277_p5 = scmp.ge.s32.totalorder %s477_s12, 1 }
   0xa   : > { %p530_p6 = por %p90_p3, %p39_p0  ;;  %p97_p7 = scmp.lt.s32.totalorder %s477_s12, 3 }
   0xb   : > { %s109_s19 = sshll.u32 %s634_s1, 4  ;;  %s479_s21 = smov [#allocation5]   ;;  %s110_s19 = int_to_ptr.hbm [resolvable:$true] %s109_s19 }
   0xc   : > { %p538_p8 = pnand %p277_p5, %p97_p7  ;;  %s111_s22 = sshll.u32 %s479_s21, 4  ;;  %s112_s22 = int_to_ptr.vmem [resolvable:$true] %s111_s22 }
   0xd   : > { %s548_s23 = sadd.s32 1, %s477_s12   ;;  %s26_s24 = sadd.s32 1, %s473_s11 }
   0xe   : > { %p298_p10 = pneg %p538_p8  ;;  %s23_s25 = ssub.s32 %s477_s12, %s548_s23 }
   0xf   : > { %p24_p12 = scmp.eq.s32.totalorder %s23_s25, 0  ;;  %p33_p13 = scmp.ne.s32.totalorder %s473_s11, %s469_s10 }
  0x10   : > { %p299_p11 = pnand %p298_p10, %p40_p1  ;;  %p34_p0 = scmp.eq.s32.totalorder %s477_s12, 0 }
  0x11   : > { %s557_s26 = scalar_select %p24_p12, %s473_s11, %s26_s24  }
  0x12   : > { %301 = dma.hbm_to_vmem [thread:$0]  (!%p299_p11), %s110_s19, 128, %s112_s22, [#allocation6]  }
  0x13   : > { %p561_p3 = por %p84_p2, %p33_p13  ;;  %p311_p5 = scmp.lt.s32.totalorder %s477_s12, 2 }
  0x14   : > { %s122_s28 = sand.u32 1, %s473_s11   ;;  %s281_s29 = sshll.u32 %s477_s12, 3 }
  0x15   : > { %p35_p7 = por %p34_p0, %p33_p13  ;;  %s280_s30 = sshll.u32 %s122_s28, 3 }
  0x16   : > { %s130_s5 = scalar_lea.hbm %s633_s0, %s281_s29  ;;  %s126_s7 = scalar_lea.vmem [#allocation2], %s280_s30 }
  0x17   : > { %s132_s6 = sshll.u32 %s130_s5, 4  ;;  %s134_s8 = sshll.u32 %s126_s7, 4  ;;  %s133_s6 = int_to_ptr.hbm [resolvable:$true] %s132_s6  ;;  %s135_s8 = int_to_ptr.vmem [resolvable:$true] %s134_s8 }
  0x18   : > { %p571_p10 = pnand %p311_p5, %p35_p7  ;;  %s123_s17 = scalar_lea.sflag [#allocation3], %s122_s28 }
  0x19   : > { %s377_s18 = sshra.s32 %s133_s6, 4  ;;  %s384_s24 = scalar_lea.hbm %s633_s0, 16  ;;  %s378_s18 = int_to_ptr.hbm [resolvable:$true] %s377_s18 }
  0x1a   : > { %s379_s19 = scalar_lea.hbm %s378_s18, 8  ;;  %p381_p11 = pneg %p571_p10 }
  0x1b   : > { %p380_p2 = scmp.ne.s32.totalorder %s378_s18, %s379_s19  ;;  %p385_p0 = scmp.lt.s32.totalorder %s378_s18, %s633_s0 }
  0x1c   : > { %p386_p5 = scmp.lt.s32.totalorder %s384_s24, %s379_s19 }
  0x1d   : > { %p382_p12 = pnand %p381_p11, %p380_p2 }
  0x1e   : > { %p387_p7 = por %p386_p5, %p385_p0 }
  0x1f   : > { %p383_p13 = pneg %p382_p12 }
  0x21   : > { %p388_p9 = pnand %p387_p7, %p383_p13 }
  0x23   : > { %391 = shalt.err (!%p388_p9)
}
  0x24   : > { %305 = dma.hbm_to_vmem [thread:$0]  (!%p571_p10), %s133_s6, 128, %s135_s8, %s123_s17  }
  0x25   : > { %143 = sbr.rel (%p538_p8) target bundleno = 60 (0x3c), region = 28  ;;  %s588_s28 = sand.u32 (!%p538_p8), 1, %s469_s10  }
  0x26   : > { %s283_s30 = sshll.u32 (!%p538_p8), %s588_s28, 3  ;;  %s146_s3 = scalar_lea.sflag (!%p538_p8), [#allocation3], %s588_s28 }
  0x27   : > { %s149_s4 = scalar_lea.vmem (!%p538_p8), [#allocation2], %s283_s30 }
  0x2a   : > { %452 = dma.done.wait (%p525_p4), %s146_s3, 128  }
  0x2b   : > { %454 = vsyncadd (%p525_p4), %s146_s3, 4294967168 }
  0x2c   : > { %456 = dma.done.wait (%p40_p1), [#allocation6], 128  }
  0x2d   : > { %458 = vsyncadd (%p40_p1), [#allocation6], 4294967168  ;;  %s287_s20 = sshll.u32 %s516_s13, 3  ;;  %s175_s8 = scalar_lea.vmem [#allocation7], %s283_s30  ;;  %v176_v0 = vld [vmem:[%s149_s4] sm:$0xff]  ;;  %v177_v1 = vld [vmem:[#allocation5] sm:$0xff] }
  0x2e   : > { %s191_s7 = scalar_lea.hbm %s635_s2, %s287_s20  ;;  %s193_s14 = sshll.u32 %s175_s8, 4  ;;  %v178_v2 = vadd.f32 %v177_v1, %v176_v0  ;;  %s194_s14 = int_to_ptr.vmem [resolvable:$true] %s193_s14 }
  0x2f   : > { %s195_s17 = sshll.u32 %s191_s7, 4  ;;  %s181_s15 = scalar_lea.sflag [#allocation4], %s588_s28  ;;  %s196_s17 = int_to_ptr.hbm [resolvable:$true] %s195_s17 }
  0x30   : > { %179 = vst [vmem:[%s175_s8] sm:$0xff] %v178_v2  ;;  %s421_s18 = sshra.s32 %s196_s17, 4  ;;  %s427_s22 = scalar_lea.hbm %s635_s2, 16  ;;  %s422_s18 = int_to_ptr.hbm [resolvable:$true] %s421_s18 }
  0x31   : > { %s423_s19 = scalar_lea.hbm %s422_s18, 8  ;;  %p428_p9 = scmp.lt.s32.totalorder %s422_s18, %s635_s2 }
  0x32   : > { %p424_p1 = scmp.ne.s32.totalorder %s422_s18, %s423_s19  ;;  %p429_p10 = scmp.lt.s32.totalorder %s427_s22, %s423_s19 }
  0x34   : > { %p425_p4 = pnand %p424_p1, %p561_p3  ;;  %p430_p2 = por %p429_p10, %p428_p9 }
  0x36   : > { %p426_p8 = pneg %p425_p4 }
  0x38   : > { %p431_p11 = pnand %p430_p2, %p426_p8 }
  0x3a   : > { %434 = shalt.err (!%p431_p11)
}
  0x3b   : > { %296 = dma.vmem_to_hbm [thread:$0]  (%p561_p3), %s194_s14, 128, %s196_s17, %s181_s15  }
  0x3c PF: > { %s207_s29 = sand.u32 1, %s465_s9   ;;  %p641_p12 = scmp.ge.s32.totalorder %s477_s12, 2 }
  0x3d   : > { %s208_s28 = scalar_lea.sflag [#allocation4], %s207_s29 }
  0x3e   : > { %p307_p13 = pnand %p641_p12, %p530_p6 }
  0x40   : > { %p308_p0 = pneg %p307_p13 }
  0x42   : > { %460 = dma.done.wait (%p308_p0), %s208_s28, 128  }
  0x43   : > { %462 = vsyncadd (%p308_p0), %s208_s28, 4294967168  ;;  %p16_p5 = scmp.ge.s32.totalorder %s548_s23, 4   ;;  %s642_s9 = smov %s469_s10 }
  0x44   : > { %s643_s10 = smov %s473_s11  ;;  %s644_s11 = smov %s557_s26 }
  0x45   : > { %s645_s12 = smov %s548_s23  ;;  %18 = sbr.rel (!%p16_p5) target bundleno = 6 (0x6), region = 77 }
  0x4a   :  { %214 = vsyncpa [#allocation3], 1 }
  0x4b   :  { %216 = vsyncpa [#allocation3 + $0x1], 1 }
  0x4c   :  { %217 = vsyncpa [#allocation6], 1 }
  0x4d   :  { %218 = vsyncpa [#allocation4], 1 }
  0x4e   :  { %220 = vsyncpa [#allocation4 + $0x1], 1 }

// kernel: tpu_custom_call.1
= control target key start
LH: loop header
LB: loop body
LE: loop exit
PB: predicated region body
PF: predicated region fallthrough
CT: control target
= control target key end

     0   :  { %vm73_vm0 = vcmask 392192   ;;  %vm147_vm1 = vcmask 130048   ;;  %vm563_vm9 = vcmask 125952   ;;  %s1187_s1 = inlined_call_operand.vmem [shape: bf16[48,16], index: 1, kind: input, shape index: {}]   ;;  %s1188_s0 = inlined_call_operand.vmem [shape: f32[128,48], index: 0, kind: input, shape index: {}]   ;;  %s1189_s2 = inlined_call_operand.vmem [shape: f32[1,16], index: 2, kind: input, shape index: {}]   ;;  %s1190_s3 = inlined_call_operand.vmem [shape: f32[1,16], index: 3, kind: input, shape index: {}]   ;;  %s1191_s4 = inlined_call_operand.vmem [shape: f32[1,16], index: 4, kind: input, shape index: {}]   ;;  %s1192_s5 = inlined_call_operand.vmem [shape: bf16[128,16], index: 5, kind: output, shape index: {}]  }
   0x1   :  { %v606_v0 = vld [vmem:[%s1187_s1 + $0x10] sm:$0xff]  ;;  %v605_v1 = vld [vmem:[%s1187_s1 + $0x8] sm:$0xff]  ;;  %v604_v2 = vld [vmem:[%s1187_s1] sm:$0xff] }
   0x2   :  { %103 = vmatpush.bf16.msra.mxu0 %v606_v0  ;;  %607 = vmatpush.bf16.msra.mxu1 %v606_v0  ;;  %v21_v3 = vld [vmem:[%s1188_s0] sm:$0xff]  ;;  %v22_v4 = vld [vmem:[%s1188_s0 + $0x8] sm:$0xff]  ;;  %v23_v15 = vld [vmem:[%s1188_s0 + $0x10] sm:$0xff] }
   0x3   :  { %608 = vmatpush.bf16.msra.mxu2 %v606_v0  ;;  %609 = vmatpush.bf16.msra.mxu3 %v606_v0  ;;  %v25_v5 = vld [vmem:[%s1188_s0 + $0x20] sm:$0xff]  ;;  %v26_v6 = vld [vmem:[%s1188_s0 + $0x28] sm:$0xff]  ;;  %v37_v11 = vpack.c.bf16 %v22_v4, %v21_v3  ;;  %v24_v16 = vld [vmem:[%s1188_s0 + $0x18] sm:$0xff] }
   0x4   :  { %v29_v7 = vld [vmem:[%s1188_s0 + $0x40] sm:$0xff]  ;;  %v30_v8 = vld [vmem:[%s1188_s0 + $0x48] sm:$0xff]  ;;  %v39_v12 = vpack.c.bf16 %v26_v6, %v25_v5  ;;  %v31_v17 = vld [vmem:[%s1188_s0 + $0x50] sm:$0xff]  ;;  %v38_v23 = vpack.c.bf16 %v24_v16, %v23_v15 }
   0x5   :  { %v33_v9 = vld [vmem:[%s1188_s0 + $0x60] sm:$0xff]  ;;  %v34_v10 = vld [vmem:[%s1188_s0 + $0x68] sm:$0xff]  ;;  %v41_v13 = vpack.c.bf16 %v30_v8, %v29_v7  ;;  %v27_v18 = vld [vmem:[%s1188_s0 + $0x30] sm:$0xff] }
   0x6   :  { %104 = vmatpush.bf16.msra.mxu0 %v605_v1  ;;  %610 = vmatpush.bf16.msra.mxu1 %v605_v1  ;;  %v43_v14 = vpack.c.bf16 %v34_v10, %v33_v9  ;;  %v28_v19 = vld [vmem:[%s1188_s0 + $0x38] sm:$0xff]  ;;  %v35_v21 = vld [vmem:[%s1188_s0 + $0x70] sm:$0xff]  ;;  %v753_v27 = vld [vmem:[%s1189_s2] ss:$0 sm:$0xff] }
   0x7   :  { %611 = vmatpush.bf16.msra.mxu2 %v605_v1  ;;  %612 = vmatpush.bf16.msra.mxu3 %v605_v1  ;;  %v32_v20 = vld [vmem:[%s1188_s0 + $0x58] sm:$0xff]  ;;  %v40_v24 = vpack.c.bf16 %v28_v19, %v27_v18 }
   0x8   :  { %v36_v22 = vld [vmem:[%s1188_s0 + $0x78] sm:$0xff]  ;;  %v42_v25 = vpack.c.bf16 %v32_v20, %v31_v17 }
   0x9   :  { %v44_v26 = vpack.c.bf16 %v36_v22, %v35_v21 }
   0xa   :  { %105 = vmatpush.bf16.msra.mxu0 %v604_v2  ;;  %613 = vmatpush.bf16.msra.mxu1 %v604_v2 }
   0xb   :  { %614 = vmatpush.bf16.msra.mxu2 %v604_v2  ;;  %615 = vmatpush.bf16.msra.mxu3 %v604_v2 }
   0xd   :  { %596 = vmatmul.msk.bf16.vlgmr.msra.gmra.mxu0 %vm73_vm0, %v37_v11  ;;  %598 = vmatmul.msk.bf16.vlgmr.msra.gmra.mxu1 %vm73_vm0, %v39_v12  ;;  %v654_v12 = vmov 16.0  }
   0xe   :  { %600 = vmatmul.msk.bf16.vlgmr.msra.gmra.mxu2 %vm73_vm0, %v41_v13  ;;  %602 = vmatmul.msk.bf16.vlgmr.msra.gmra.mxu3 %vm73_vm0, %v43_v14  ;;  %620 = vrcp.f32 %v654_v12 }
  0x14   :  { %v621_v13 = vpop.eup %620 }
  0x15   :  { %v197_v14 = vmul.f32 16.0, %v621_v13  ;;  %vm201_vm2 = vweird.f32 %v621_v13 }
  0x17   :  { %v198_v15 = vsub.f32 1.0, %v197_v14 }
  0x19   :  { %v199_v16 = vmul.f32 %v621_v13, %v198_v15 }
  0x1b   :  { %v200_v17 = vadd.f32 %v621_v13, %v199_v16 }
  0x1d   :  { %597 = vmatmul.msk.bf16.gmra.mxu0 %vm73_vm0, %v38_v23  ;;  %599 = vmatmul.msk.bf16.gmra.mxu1 %vm73_vm0, %v40_v24  ;;  %v835_v18 = vsel %vm201_vm2, %v621_v13, %v200_v17 }
  0x1e   :  { %601 = vmatmul.msk.bf16.gmra.mxu2 %vm73_vm0, %v42_v25  ;;  %603 = vmatmul.msk.bf16.gmra.mxu3 %vm73_vm0, %v44_v26 }
  0x8a   :  { %v107_v28 = vpop.f32.mrf.mxu0  ;;  %v117_v29 = vpop.f32.mrf.mxu1 }
  0x8b   :  { %v756_v30 = vadd.f32 %v753_v27, %v107_v28  ;;  %v759_v31 = vadd.f32 %v753_v27, %v117_v29 }
  0x8d   :  { %v160_v32 = vsel %vm147_vm1, %v759_v31, 0.0  ;;  %v148_v33 = vsel %vm147_vm1, %v756_v30, 0.0 }
  0x8e   :  { %161 = vadd.xlane.f32.xlu2 %v160_v32  ;;  %149 = vadd.xlane.f32.xlu0 %v148_v33 }
  0x91   :  { %v127_v34 = vpop.f32.mrf.mxu2  ;;  %v137_v35 = vpop.f32.mrf.mxu3 }
  0x92   :  { %v766_v36 = vadd.f32 %v753_v27, %v127_v34  ;;  %v769_v37 = vadd.f32 %v753_v27, %v137_v35  ;;  %v109_v38 = vpop.f32.mrf.mxu0  ;;  %v119_v41 = vpop.f32.mrf.mxu1 }
  0x93   :  { %v776_v42 = vadd.f32 %v753_v27, %v109_v38  ;;  %v779_v43 = vadd.f32 %v753_v27, %v119_v41 }
  0x94   :  { %v172_v39 = vsel %vm147_vm1, %v766_v36, 0.0  ;;  %v184_v40 = vsel %vm147_vm1, %v769_v37, 0.0 }
  0x95   :  { %v163_v49 = vsel %vm147_vm1, %v779_v43, 0.0  ;;  %v151_v50 = vsel %vm147_vm1, %v776_v42, 0.0 }
  0x96   :  { %173 = vadd.xlane.f32.xlu2 %v172_v39  ;;  %185 = vadd.xlane.f32.xlu0 %v184_v40 }
  0x99   :  { %v129_v44 = vpop.f32.mrf.mxu2  ;;  %v139_v45 = vpop.f32.mrf.mxu3 }
  0x9a   :  { %v782_v46 = vadd.f32 %v753_v27, %v139_v45  ;;  %v112_v48 = vpop.f32.mrf.mxu0  ;;  %v794_v52 = vadd.f32 %v753_v27, %v129_v44  ;;  %v122_v58 = vpop.f32.mrf.mxu1 }
  0x9b   :  { %v791_v51 = vadd.f32 %v753_v27, %v112_v48  ;;  %v804_v59 = vadd.f32 %v753_v27, %v122_v58 }
  0x9c   :  { %v187_v47 = vsel %vm147_vm1, %v782_v46, 0.0  ;;  %v175_v56 = vsel %vm147_vm1, %v794_v52, 0.0 }
  0x9d   :  { %188 = vadd.xlane.f32.xlu1 %v187_v47  ;;  %v154_v54 = vsel %vm147_vm1, %v791_v51, 0.0  ;;  %v166_v63 = vsel %vm147_vm1, %v804_v59, 0.0 }
  0x9e   :  { %164 = vadd.xlane.f32.xlu2 %v163_v49  ;;  %152 = vadd.xlane.f32.xlu0 %v151_v50 }
  0xa1   :  { %v132_v53 = vpop.f32.mrf.mxu2  ;;  %v142_v55 = vpop.f32.mrf.mxu3 }
  0xa2   :  { %v801_v57 = vadd.f32 %v753_v27, %v132_v53  ;;  %v114_v2 = vpop.f32.mrf.mxu0  ;;  %v816_v3 = vadd.f32 %v753_v27, %v142_v55  ;;  %v124_v9 = vpop.f32.mrf.mxu1 }
  0xa3   :  { %v822_v5 = vadd.f32 %v753_v27, %v114_v2  ;;  %v831_v10 = vadd.f32 %v753_v27, %v124_v9 }
  0xa4   :  { %v178_v62 = vsel %vm147_vm1, %v801_v57, 0.0  ;;  %v190_v6 = vsel %vm147_vm1, %v816_v3, 0.0 }
  0xa5   :  { %155 = vadd.xlane.f32.xlu1 %v154_v54  ;;  %v157_v8 = vsel %vm147_vm1, %v822_v5, 0.0  ;;  %v169_v11 = vsel %vm147_vm1, %v831_v10, 0.0 }
  0xa6   :  { %176 = vadd.xlane.f32.xlu0 %v175_v56 }
  0xa9   :  { %v134_v60 = vpop.f32.mrf.mxu2  ;;  %v144_v1 = vpop.f32.mrf.mxu3 }
  0xaa   :  { %v807_v61 = vadd.f32 %v753_v27, %v134_v60  ;;  %v819_v4 = vadd.f32 %v753_v27, %v144_v1 }
  0xac   :  { %v181_v0 = vsel %vm147_vm1, %v807_v61, 0.0  ;;  %v193_v7 = vsel %vm147_vm1, %v819_v4, 0.0 }
  0xad   :  { %182 = vadd.xlane.f32.xlu2 %v181_v0  ;;  %179 = vadd.xlane.f32.xlu1 %v178_v62 }
  0xae   :  { %167 = vadd.xlane.f32.xlu0 %v166_v63 }
  0xb5   :  { %191 = vadd.xlane.f32.xlu2 %v190_v6  ;;  %158 = vadd.xlane.f32.xlu1 %v157_v8 }
  0xb6   :  { %194 = vadd.xlane.f32.xlu0 %v193_v7 }
  0xbd   :  { %170 = vadd.xlane.f32.xlu1 %v169_v11 }
 0x101   :  { %v162_v19 = vpop.xlane.xlu2 %161  ;;  %v150_v20 = vpop.xlane.xlu0 %149 }
 0x102   :  { %v207_v21 = vmul.f32 %v835_v18, %v162_v19  ;;  %v203_v22 = vmul.f32 %v835_v18, %v150_v20 }
 0x104   :  { %v840_v23 = vsub.f32 %v759_v31, %v207_v21  ;;  %v843_v24 = vsub.f32 %v756_v30, %v203_v22 }
 0x106   :  { %v239_v25 = vmul.f32 %v840_v23, %v840_v23  ;;  %v235_v26 = vmul.f32 %v843_v24, %v843_v24 }
 0x108   :  { %v263_v27 = vsel %vm147_vm1, %v239_v25, 0.0  ;;  %v251_v28 = vsel %vm147_vm1, %v235_v26, 0.0 }
 0x109   :  { %264 = vadd.xlane.f32.xlu2 %v263_v27  ;;  %v174_v29 = vpop.xlane.xlu2 %173  ;;  %252 = vadd.xlane.f32.xlu1 %v251_v28  ;;  %v186_v32 = vpop.xlane.xlu0 %185 }
 0x10a   :  { %v211_v31 = vmul.f32 %v835_v18, %v174_v29  ;;  %v215_v33 = vmul.f32 %v835_v18, %v186_v32 }
 0x10c   :  { %v854_v30 = vsub.f32 %v766_v36, %v211_v31  ;;  %v857_v34 = vsub.f32 %v769_v37, %v215_v33 }
 0x10e   :  { %v243_v35 = vmul.f32 %v854_v30, %v854_v30  ;;  %v247_v38 = vmul.f32 %v857_v34, %v857_v34 }
 0x110   :  { %v863_v39 = vpop.xlane.xlu1 %188  ;;  %v275_v40 = vsel %vm147_vm1, %v243_v35, 0.0  ;;  %v287_v41 = vsel %vm147_vm1, %v247_v38, 0.0 }
 0x111   :  { %v165_v44 = vpop.xlane.xlu2 %164  ;;  %276 = vadd.xlane.f32.xlu0 %v275_v40  ;;  %288 = vadd.xlane.f32.xlu1 %v287_v41  ;;  %v153_v36 = vpop.xlane.xlu0 %152 }
 0x112   :  { %v208_v45 = vmul.f32 %v835_v18, %v165_v44  ;;  %v204_v37 = vmul.f32 %v835_v18, %v153_v36 }
 0x114   :  { %v870_v47 = vsub.f32 %v779_v43, %v208_v45  ;;  %v873_v48 = vsub.f32 %v776_v42, %v204_v37 }
 0x116   :  { %v240_v49 = vmul.f32 %v870_v47, %v870_v47  ;;  %v236_v50 = vmul.f32 %v873_v48, %v873_v48 }
 0x118   :  { %v156_v53 = vpop.xlane.xlu1 %155  ;;  %v266_v54 = vsel %vm147_vm1, %v240_v49, 0.0  ;;  %v254_v55 = vsel %vm147_vm1, %v236_v50, 0.0 }
 0x119   :  { %v205_v56 = vmul.f32 %v835_v18, %v156_v53  ;;  %267 = vadd.xlane.f32.xlu0 %v266_v54  ;;  %255 = vadd.xlane.f32.xlu2 %v254_v55  ;;  %v177_v43 = vpop.xlane.xlu0 %176 }
 0x11a   :  { %v212_v58 = vmul.f32 %v835_v18, %v177_v43 }
 0x11b   :  { %v884_v42 = vsub.f32 %v791_v51, %v205_v56 }
 0x11c   :  { %v887_v60 = vsub.f32 %v794_v52, %v212_v58 }
 0x11d   :  { %v237_v62 = vmul.f32 %v884_v42, %v884_v42 }
 0x11e   :  { %v244_v63 = vmul.f32 %v887_v60, %v887_v60 }
 0x11f   :  { %v257_v2 = vsel %vm147_vm1, %v237_v62, 0.0 }
 0x120   :  { %v183_v0 = vpop.xlane.xlu2 %182  ;;  %v180_v1 = vpop.xlane.xlu1 %179  ;;  %v278_v6 = vsel %vm147_vm1, %v244_v63, 0.0 }
 0x121   :  { %v214_v7 = vmul.f32 %v835_v18, %v183_v0  ;;  %v213_v51 = vmul.f32 %v835_v18, %v180_v1  ;;  %258 = vadd.xlane.f32.xlu0 %v257_v2  ;;  %279 = vadd.xlane.f32.xlu1 %v278_v6  ;;  %v168_v52 = vpop.xlane.xlu0 %167 }
 0x122   :  { %v209_v8 = vmul.f32 %v835_v18, %v168_v52 }
 0x123   :  { %v899_v9 = vsub.f32 %v807_v61, %v214_v7  ;;  %v902_v11 = vsub.f32 %v801_v57, %v213_v51 }
 0x124   :  { %v905_v12 = vsub.f32 %v804_v59, %v209_v8 }
 0x125   :  { %v245_v13 = vmul.f32 %v902_v11, %v902_v11  ;;  %v246_v14 = vmul.f32 %v899_v9, %v899_v9 }
 0x126   :  { %v241_v15 = vmul.f32 %v905_v12, %v905_v12 }
 0x127   :  { %v281_v16 = vsel %vm147_vm1, %v245_v13, 0.0  ;;  %v284_v57 = vsel %vm147_vm1, %v246_v14, 0.0 }
 0x128   :  { %v192_v17 = vpop.xlane.xlu2 %191  ;;  %v159_v61 = vpop.xlane.xlu1 %158  ;;  %282 = vadd.xlane.f32.xlu2 %v281_v16  ;;  %v269_v19 = vsel %vm147_vm1, %v241_v15, 0.0 }
 0x129   :  { %v217_v59 = vmul.f32 %v835_v18, %v192_v17  ;;  %v206_v20 = vmul.f32 %v835_v18, %v159_v61  ;;  %285 = vadd.xlane.f32.xlu0 %v284_v57  ;;  %270 = vadd.xlane.f32.xlu1 %v269_v19  ;;  %v195_v21 = vpop.xlane.xlu0 %194 }
 0x12a   :  { %v218_v26 = vmul.f32 %v835_v18, %v195_v21  ;;  %v972_v21 = vld [vmem:[%s1190_s3] ss:$0 sm:$0xff] }
 0x12b   :  { %v919_v22 = vsub.f32 %v816_v3, %v217_v59  ;;  %v922_v25 = vsub.f32 %v822_v5, %v206_v20  ;;  %v216_v5 = vmul.f32 %v835_v18, %v863_v39 }
 0x12c   :  { %v930_v29 = vsub.f32 %v819_v4, %v218_v26 }
 0x12d   :  { %v249_v27 = vmul.f32 %v919_v22, %v919_v22  ;;  %v238_v28 = vmul.f32 %v922_v25, %v922_v25  ;;  %v945_v40 = vsub.f32 %v782_v46, %v216_v5 }
 0x12e   :  { %v250_v38 = vmul.f32 %v930_v29, %v930_v29 }
 0x12f   :  { %v293_v31 = vsel %vm147_vm1, %v249_v27, 0.0  ;;  %v260_v3 = vsel %vm147_vm1, %v238_v28, 0.0  ;;  %v248_v39 = vmul.f32 %v945_v40, %v945_v40 }
 0x130   :  { %v171_v32 = vpop.xlane.xlu1 %170  ;;  %v296_v44 = vsel %vm147_vm1, %v250_v38, 0.0 }
 0x131   :  { %v210_v33 = vmul.f32 %v835_v18, %v171_v32  ;;  %294 = vadd.xlane.f32.xlu0 %v293_v31  ;;  %261 = vadd.xlane.f32.xlu1 %v260_v3  ;;  %v980_v31 = vld [vmem:[%s1191_s4] ss:$0 sm:$0xff] }
 0x133   :  { %v938_v35 = vsub.f32 %v831_v10, %v210_v33  ;;  %v290_v10 = vsel %vm147_vm1, %v248_v39, 0.0 }
 0x135   :  { %v242_v4 = vmul.f32 %v938_v35, %v938_v35 }
 0x137   :  { %v272_v41 = vsel %vm147_vm1, %v242_v4, 0.0 }
 0x138   :  { %273 = vadd.xlane.f32.xlu2 %v272_v41 }
 0x139   :  { %297 = vadd.xlane.f32.xlu1 %v296_v44 }
 0x140   :  { %291 = vadd.xlane.f32.xlu2 %v290_v10 }
 0x17c   :  { %v265_v36 = vpop.xlane.xlu2 %264  ;;  %v253_v45 = vpop.xlane.xlu1 %252 }
 0x17d   :  { %v303_v37 = vmul.f32 %v265_v36, %v835_v18  ;;  %v299_v49 = vmul.f32 %v253_v45, %v835_v18 }
 0x17f   :  { %v319_v46 = vadd.f32 1e-05, %v303_v37  ;;  %v315_v50 = vadd.f32 1e-05, %v299_v49 }
 0x181   :  { %622 = vrsqrt.f32 %v319_v46  ;;  %vm377_vm5 = vweird.f32 %v319_v46  ;;  %vm337_vm7 = vweird.f32 %v315_v50 }
 0x182   :  { %624 = vrsqrt.f32 %v315_v50 }
 0x184   :  { %v289_v53 = vpop.xlane.xlu1 %288  ;;  %v277_v54 = vpop.xlane.xlu0 %276 }
 0x185   :  { %v311_v55 = vmul.f32 %v289_v53, %v835_v18  ;;  %v307_v56 = vmul.f32 %v277_v54, %v835_v18 }
 0x187   :  { %v623_v43 = vpop.eup %622  ;;  %v956_v58 = vadd.f32 1e-05, %v311_v55  ;;  %v958_v62 = vadd.f32 1e-05, %v307_v56 }
 0x188   :  { %v625_v63 = vpop.eup %624  ;;  %v372_v0 = vmul.f32 %v623_v43, %v319_v46  ;;  %vm378_vm3 = vweird.f32 %v623_v43 }
 0x189   :  { %v332_v1 = vmul.f32 %v625_v63, %v315_v50  ;;  %626 = vrsqrt.f32 %v956_v58  ;;  %vm338_vm4 = vweird.f32 %v625_v63  ;;  %vm379_vm6 = vmor %vm377_vm5, %vm378_vm3  ;;  %vm457_vm10 = vweird.f32 %v956_v58 }
 0x18a   :  { %v373_v2 = vmul.f32 %v623_v43, %v372_v0  ;;  %628 = vrsqrt.f32 %v958_v62  ;;  %vm339_vm8 = vmor %vm337_vm7, %vm338_vm4  ;;  %vm417_vm14 = vweird.f32 %v958_v62 }
 0x18b   :  { %v333_v6 = vmul.f32 %v625_v63, %v332_v1 }
 0x18c   :  { %v374_v7 = vmul.f32 0.5, %v373_v2  ;;  %v256_v51 = vpop.xlane.xlu2 %255  ;;  %v268_v52 = vpop.xlane.xlu0 %267 }
 0x18d   :  { %v334_v8 = vmul.f32 0.5, %v333_v6  ;;  %v300_v13 = vmul.f32 %v256_v51, %v835_v18  ;;  %v304_v14 = vmul.f32 %v268_v52, %v835_v18 }
 0x18e   :  { %v375_v15 = vsub.f32 1.5, %v374_v7 }
 0x18f   :  { %v627_v16 = vpop.eup %626  ;;  %v335_v17 = vsub.f32 1.5, %v334_v8  ;;  %v964_v61 = vadd.f32 1e-05, %v300_v13  ;;  %v966_v57 = vadd.f32 1e-05, %v304_v14 }
 0x190   :  { %v629_v19 = vpop.eup %628  ;;  %v376_v59 = vmul.f32 %v623_v43, %v375_v15  ;;  %v452_v20 = vmul.f32 %v627_v16, %v956_v58  ;;  %vm458_vm11 = vweird.f32 %v627_v16 }
 0x191   :  { %v336_v26 = vmul.f32 %v625_v63, %v335_v17  ;;  %v412_v27 = vmul.f32 %v629_v19, %v958_v62  ;;  %630 = vrsqrt.f32 %v964_v61  ;;  %vm418_vm12 = vweird.f32 %v629_v19  ;;  %vm459_vm13 = vmor %vm457_vm10, %vm458_vm11 }
 0x192   :  { %v380_v28 = vsel %vm379_vm6, %v623_v43, %v376_v59  ;;  %v453_v32 = vmul.f32 %v627_v16, %v452_v20  ;;  %632 = vrsqrt.f32 %v966_v57  ;;  %vm419_vm15 = vmor %vm417_vm14, %vm418_vm12  ;;  %vm347_vm0 = vweird.f32 %v964_v61 }
 0x193   :  { %v495_v3 = vmul.f32 %v380_v28, %v840_v23  ;;  %v340_v33 = vsel %vm339_vm8, %v625_v63, %v336_v26  ;;  %v413_v5 = vmul.f32 %v629_v19, %v412_v27  ;;  %vm387_vm3 = vweird.f32 %v966_v57 }
 0x194   :  { %v491_v38 = vmul.f32 %v340_v33, %v843_v24  ;;  %v454_v4 = vmul.f32 0.5, %v453_v32  ;;  %v280_v41 = vpop.xlane.xlu1 %279  ;;  %v259_v44 = vpop.xlane.xlu0 %258 }
 0x195   :  { %v515_v39 = vmul.f32 %v972_v21, %v495_v3  ;;  %v414_v10 = vmul.f32 0.5, %v413_v5  ;;  %v308_v36 = vmul.f32 %v280_v41, %v835_v18  ;;  %v301_v45 = vmul.f32 %v259_v44, %v835_v18 }
 0x196   :  { %v511_v37 = vmul.f32 %v972_v21, %v491_v38  ;;  %v455_v49 = vsub.f32 1.5, %v454_v4 }
 0x197   :  { %v631_v23 = vpop.eup %630  ;;  %v535_v46 = vadd.f32 %v980_v31, %v515_v39  ;;  %v415_v24 = vsub.f32 1.5, %v414_v10  ;;  %v990_v50 = vadd.f32 1e-05, %v308_v36  ;;  %v994_v43 = vadd.f32 1e-05, %v301_v45 }
 0x198   :  { %v633_v53 = vpop.eup %632  ;;  %v531_v54 = vadd.f32 %v980_v31, %v511_v37  ;;  %v456_v55 = vmul.f32 %v627_v16, %v455_v49  ;;  %v342_v56 = vmul.f32 %v631_v23, %v964_v61  ;;  %vm348_vm1 = vweird.f32 %v631_v23 }
 0x199   :  { %v551_v63 = vpack.c.bf16 %v535_v46, %v535_v46  ;;  %v416_v0 = vmul.f32 %v629_v19, %v415_v24  ;;  %v382_v58 = vmul.f32 %v633_v53, %v966_v57  ;;  %634 = vrsqrt.f32 %v990_v50  ;;  %vm349_vm4 = vmor %vm347_vm0, %vm348_vm1 }
 0x19a   :  { %v547_v1 = vpack.c.bf16 %v531_v54, %v531_v54  ;;  %v460_v2 = vsel %vm459_vm13, %v627_v16, %v456_v55  ;;  %v343_v6 = vmul.f32 %v631_v23, %v342_v56  ;;  %636 = vrsqrt.f32 %v994_v43 }
 0x19b   :  { %568 = vst.msk [vmem:[%s1192_s5 + $0x10] sm:$0xf] %vm563_vm9, %v551_v63  ;;  %v503_v7 = vmul.f32 %v460_v2, %v857_v34  ;;  %v420_v51 = vsel %vm419_vm15, %v629_v19, %v416_v0  ;;  %v383_v52 = vmul.f32 %v633_v53, %v382_v58  ;;  %v283_v8 = vpop.xlane.xlu2 %282  ;;  %vm388_vm2 = vweird.f32 %v633_v53 }
 0x19c   :  { %564 = vst.msk [vmem:[%s1192_s5] sm:$0xf] %vm563_vm9, %v547_v1  ;;  %v499_v62 = vmul.f32 %v420_v51, %v854_v30  ;;  %v344_v13 = vmul.f32 0.5, %v343_v6  ;;  %v271_v14 = vpop.xlane.xlu1 %270  ;;  %v286_v15 = vpop.xlane.xlu0 %285  ;;  %v309_v17 = vmul.f32 %v283_v8, %v835_v18  ;;  %vm389_vm5 = vmor %vm387_vm3, %vm388_vm2  ;;  %vm427_vm6 = vweird.f32 %v990_v50 }
 0x19d   :  { %v523_v16 = vmul.f32 %v972_v21, %v503_v7  ;;  %v384_v34 = vmul.f32 0.5, %v383_v52  ;;  %v305_v19 = vmul.f32 %v271_v14, %v835_v18  ;;  %v310_v30 = vmul.f32 %v286_v15, %v835_v18 }
 0x19e   :  { %v519_v59 = vmul.f32 %v972_v21, %v499_v62  ;;  %v345_v20 = vsub.f32 1.5, %v344_v13  ;;  %v1018_v28 = vadd.f32 1e-05, %v309_v17  ;;  %vm357_vm11 = vweird.f32 %v994_v43 }
 0x19f   :  { %v543_v26 = vadd.f32 %v980_v31, %v523_v16  ;;  %v385_v27 = vsub.f32 1.5, %v384_v34  ;;  %v635_v32 = vpop.eup %634  ;;  %v1022_v5 = vadd.f32 1e-05, %v305_v19  ;;  %v1027_v44 = vadd.f32 1e-05, %v310_v30 }
 0x1a0   :  { %v539_v3 = vadd.f32 %v980_v31, %v519_v59  ;;  %v346_v33 = vmul.f32 %v631_v23, %v345_v20  ;;  %v422_v41 = vmul.f32 %v635_v32, %v990_v50  ;;  %v637_v39 = vpop.eup %636  ;;  %638 = vrsqrt.f32 %v1018_v28 }
 0x1a1   :  { %v559_v38 = vpack.c.bf16 %v543_v26, %v543_v26  ;;  %v386_v4 = vmul.f32 %v633_v53, %v385_v27  ;;  %v352_v37 = vmul.f32 %v637_v39, %v994_v43  ;;  %640 = vrsqrt.f32 %v1022_v5 }
 0x1a2   :  { %v555_v10 = vpack.c.bf16 %v539_v3, %v539_v3  ;;  %v350_v36 = vsel %vm349_vm4, %v631_v23, %v346_v33  ;;  %v423_v45 = vmul.f32 %v635_v32, %v422_v41  ;;  %642 = vrsqrt.f32 %v1027_v44 }
 0x1a3   :  { %576 = vst.msk [vmem:[%s1192_s5 + $0x30] sm:$0xf] %vm563_vm9, %v559_v38  ;;  %v492_v61 = vmul.f32 %v350_v36, %v873_v48  ;;  %v390_v57 = vsel %vm389_vm5, %v633_v53, %v386_v4  ;;  %v353_v55 = vmul.f32 %v637_v39, %v352_v37  ;;  %vm428_vm7 = vweird.f32 %v635_v32 }
 0x1a4   :  { %572 = vst.msk [vmem:[%s1192_s5 + $0x20] sm:$0xf] %vm563_vm9, %v555_v10  ;;  %v496_v49 = vmul.f32 %v390_v57, %v870_v47  ;;  %v262_v23 = vpop.xlane.xlu1 %261  ;;  %v295_v46 = vpop.xlane.xlu0 %294  ;;  %v424_v54 = vmul.f32 0.5, %v423_v45  ;;  %vm358_vm8 = vweird.f32 %v637_v39  ;;  %vm429_vm10 = vmor %vm427_vm6, %vm428_vm7  ;;  %vm437_vm12 = vweird.f32 %v1018_v28 }
 0x1a5   :  { %v512_v24 = vmul.f32 %v972_v21, %v492_v61  ;;  %v302_v53 = vmul.f32 %v262_v23, %v835_v18  ;;  %v313_v56 = vmul.f32 %v295_v46, %v835_v18  ;;  %v354_v0 = vmul.f32 0.5, %v353_v55  ;;  %vm359_vm13 = vmor %vm357_vm11, %vm358_vm8 }
 0x1a6   :  { %v516_v48 = vmul.f32 %v972_v21, %v496_v49  ;;  %v425_v63 = vsub.f32 1.5, %v424_v54  ;;  %v1050_v58 = vpop.eup %638  ;;  %vm397_vm14 = vweird.f32 %v1022_v5  ;;  %vm447_vm15 = vweird.f32 %v1027_v44 }
 0x1a7   :  { %v532_v47 = vadd.f32 %v980_v31, %v512_v24  ;;  %v1053_v2 = vadd.f32 1e-05, %v302_v53  ;;  %v1055_v6 = vadd.f32 1e-05, %v313_v56  ;;  %v355_v52 = vsub.f32 1.5, %v354_v0  ;;  %v1059_v62 = vpop.eup %640 }
 0x1a8   :  { %v536_v1 = vadd.f32 %v980_v31, %v516_v48  ;;  %v426_v51 = vmul.f32 %v635_v32, %v425_v63  ;;  %v432_v8 = vmul.f32 %v1050_v58, %v1018_v28  ;;  %v643_v14 = vpop.eup %642  ;;  %v392_v50 = vmul.f32 %v1059_v62, %v1022_v5 }
 0x1a9   :  { %v548_v7 = vpack.c.bf16 %v532_v47, %v532_v47  ;;  %644 = vrsqrt.f32 %v1053_v2  ;;  %v356_v16 = vmul.f32 %v637_v39, %v355_v52  ;;  %v442_v17 = vmul.f32 %v643_v14, %v1027_v44 }
 0x1aa   :  { %v552_v13 = vpack.c.bf16 %v536_v1, %v536_v1  ;;  %v430_v15 = vsel %vm429_vm10, %v635_v32, %v426_v51  ;;  %v433_v34 = vmul.f32 %v1050_v58, %v432_v8  ;;  %v393_v26 = vmul.f32 %v1059_v62, %v392_v50 }
 0x1ab   :  { %565 = vst.msk [vmem:[%s1192_s5 + $0x4] sm:$0xf] %vm563_vm9, %v548_v7  ;;  %v500_v43 = vmul.f32 %v430_v15, %v887_v60  ;;  %v274_v19 = vpop.xlane.xlu2 %273  ;;  %v360_v20 = vsel %vm359_vm13, %v637_v39, %v356_v16  ;;  %646 = vrsqrt.f32 %v1055_v6  ;;  %vm438_vm0 = vweird.f32 %v1050_v58 }
 0x1ac   :  { %569 = vst.msk [vmem:[%s1192_s5 + $0x14] sm:$0xf] %vm563_vm9, %v552_v13  ;;  %v298_v59 = vpop.xlane.xlu1 %297  ;;  %v434_v30 = vmul.f32 0.5, %v433_v34  ;;  %v493_v60 = vmul.f32 %v360_v20, %v884_v42  ;;  %v443_v32 = vmul.f32 %v643_v14, %v442_v17  ;;  %v394_v33 = vmul.f32 0.5, %v393_v26  ;;  %vm439_vm3 = vmor %vm437_vm12, %vm438_vm0 }
 0x1ad   :  { %v520_v27 = vmul.f32 %v972_v21, %v500_v43  ;;  %v306_v38 = vmul.f32 %v274_v19, %v835_v18  ;;  %v314_v4 = vmul.f32 %v298_v59, %v835_v18  ;;  %vm398_vm1 = vweird.f32 %v1059_v62 }
 0x1ae   :  { %v435_v3 = vsub.f32 1.5, %v434_v30  ;;  %v513_v10 = vmul.f32 %v972_v21, %v493_v60  ;;  %v444_v36 = vmul.f32 0.5, %v443_v32  ;;  %v395_v42 = vsub.f32 1.5, %v394_v33  ;;  %vm399_vm4 = vmor %vm397_vm14, %vm398_vm1 }
 0x1af   :  { %v645_v41 = vpop.eup %644  ;;  %v540_v39 = vadd.f32 %v980_v31, %v520_v27  ;;  %vm448_vm2 = vweird.f32 %v643_v14  ;;  %v1099_v23 = vadd.f32 1e-05, %v306_v38  ;;  %v1103_v48 = vadd.f32 1e-05, %v314_v4 }
 0x1b0   :  { %v436_v61 = vmul.f32 %v1050_v58, %v435_v3  ;;  %v362_v57 = vmul.f32 %v645_v41, %v1053_v2  ;;  %v533_v37 = vadd.f32 %v980_v31, %v513_v10  ;;  %v445_v49 = vsub.f32 1.5, %v444_v36  ;;  %vm449_vm5 = vmor %vm447_vm15, %vm448_vm2 }
 0x1b1   :  { %v556_v45 = vpack.c.bf16 %v540_v39, %v540_v39  ;;  %v647_v46 = vpop.eup %646  ;;  %v396_v54 = vmul.f32 %v1059_v62, %v395_v42  ;;  %648 = vrsqrt.f32 %v1099_v23  ;;  %vm368_vm6 = vweird.f32 %v645_v41 }
 0x1b2   :  { %v440_v24 = vsel %vm439_vm3, %v1050_v58, %v436_v61  ;;  %v363_v55 = vmul.f32 %v645_v41, %v362_v57  ;;  %v549_v53 = vpack.c.bf16 %v533_v37, %v533_v37  ;;  %v446_v56 = vmul.f32 %v643_v14, %v445_v49 }
 0x1b3   :  { %573 = vst.msk [vmem:[%s1192_s5 + $0x24] sm:$0xf] %vm563_vm9, %v556_v45  ;;  %v501_v28 = vmul.f32 %v440_v24, %v902_v11  ;;  %v472_v47 = vmul.f32 %v647_v46, %v1055_v6  ;;  %v400_v63 = vsel %vm399_vm4, %v1059_v62, %v396_v54  ;;  %v292_v7 = vpop.xlane.xlu2 %291  ;;  %650 = vrsqrt.f32 %v1103_v48 }
 0x1b4   :  { %v364_v0 = vmul.f32 0.5, %v363_v55  ;;  %566 = vst.msk [vmem:[%s1192_s5 + $0x8] sm:$0xf] %vm563_vm9, %v549_v53  ;;  %v497_v5 = vmul.f32 %v400_v63, %v905_v12  ;;  %v450_v58 = vsel %vm449_vm5, %v643_v14, %v446_v56  ;;  %vm367_vm7 = vweird.f32 %v1053_v2 }
 0x1b5   :  { %v521_v11 = vmul.f32 %v972_v21, %v501_v28  ;;  %v473_v1 = vmul.f32 %v647_v46, %v472_v47  ;;  %v502_v51 = vmul.f32 %v450_v58, %v899_v9  ;;  %v312_v12 = vmul.f32 %v292_v7, %v835_v18  ;;  %vm369_vm8 = vmor %vm367_vm7, %vm368_vm6 }
 0x1b6   :  { %v365_v52 = vsub.f32 1.5, %v364_v0  ;;  %v517_v8 = vmul.f32 %v972_v21, %v497_v5  ;;  %vm478_vm10 = vweird.f32 %v647_v46  ;;  %vm477_vm11 = vweird.f32 %v1055_v6 }
 0x1b7   :  { %v541_v44 = vadd.f32 %v980_v31, %v521_v11  ;;  %v474_v62 = vmul.f32 0.5, %v473_v1  ;;  %v522_v13 = vmul.f32 %v972_v21, %v502_v51  ;;  %v649_v34 = vpop.eup %648  ;;  %v328_v17 = vadd.f32 1e-05, %v312_v12  ;;  %vm479_vm12 = vmor %vm477_vm11, %vm478_vm10 }
 0x1b8   :  { %v366_v15 = vmul.f32 %v645_v41, %v365_v52  ;;  %v537_v16 = vadd.f32 %v980_v31, %v517_v8  ;;  %v402_v59 = vmul.f32 %v649_v34, %v1099_v23  ;;  %vm408_vm13 = vweird.f32 %v649_v34 }
 0x1b9   :  { %v557_v14 = vpack.c.bf16 %v541_v44, %v541_v44  ;;  %v475_v9 = vsub.f32 1.5, %v474_v62  ;;  %v542_v50 = vadd.f32 %v980_v31, %v522_v13  ;;  %v651_v20 = vpop.eup %650  ;;  %652 = vrsqrt.f32 %v328_v17 }
 0x1ba   :  { %v370_v43 = vsel %vm369_vm8, %v645_v41, %v366_v15  ;;  %v553_v2 = vpack.c.bf16 %v537_v16, %v537_v16  ;;  %v403_v27 = vmul.f32 %v649_v34, %v402_v59  ;;  %v482_v60 = vmul.f32 %v651_v20, %v1103_v48 }
 0x1bb   :  { %574 = vst.msk [vmem:[%s1192_s5 + $0x28] sm:$0xf] %vm563_vm9, %v557_v14  ;;  %v494_v18 = vmul.f32 %v370_v43, %v922_v25  ;;  %v476_v19 = vmul.f32 %v647_v46, %v475_v9  ;;  %v558_v30 = vpack.c.bf16 %v542_v50, %v542_v50  ;;  %vm407_vm14 = vweird.f32 %v1099_v23 }
 0x1bc   :  { %570 = vst.msk [vmem:[%s1192_s5 + $0x18] sm:$0xf] %vm563_vm9, %v553_v2  ;;  %v404_v3 = vmul.f32 0.5, %v403_v27  ;;  %v483_v33 = vmul.f32 %v651_v20, %v482_v60  ;;  %vm488_vm15 = vweird.f32 %v651_v20  ;;  %vm409_vm0 = vmor %vm407_vm14, %vm408_vm13  ;;  %vm487_vm1 = vweird.f32 %v1103_v48 }
 0x1bd   :  { %v514_v6 = vmul.f32 %v972_v21, %v494_v18  ;;  %v480_v26 = vsel %vm479_vm12, %v647_v46, %v476_v19  ;;  %575 = vst.msk [vmem:[%s1192_s5 + $0x2c] sm:$0xf] %vm563_vm9, %v558_v30  ;;  %vm489_vm2 = vmor %vm487_vm1, %vm488_vm15  ;;  %vm467_vm4 = vweird.f32 %v328_v17 }
 0x1be   :  { %v505_v25 = vmul.f32 %v480_v26, %v919_v22  ;;  %v405_v41 = vsub.f32 1.5, %v404_v3  ;;  %v484_v39 = vmul.f32 0.5, %v483_v33 }
 0x1bf   :  { %v534_v32 = vadd.f32 %v980_v31, %v514_v6  ;;  %v653_v10 = vpop.eup %652 }
 0x1c0   :  { %v525_v38 = vmul.f32 %v972_v21, %v505_v25  ;;  %v406_v22 = vmul.f32 %v649_v34, %v405_v41  ;;  %v485_v61 = vsub.f32 1.5, %v484_v39  ;;  %v462_v42 = vmul.f32 %v653_v10, %v328_v17 }
 0x1c1   :  { %v550_v4 = vpack.c.bf16 %v534_v32, %v534_v32  ;;  %vm468_vm3 = vweird.f32 %v653_v10 }
 0x1c2   :  { %v545_v36 = vadd.f32 %v980_v31, %v525_v38  ;;  %v410_v45 = vsel %vm409_vm0, %v649_v34, %v406_v22  ;;  %v486_v37 = vmul.f32 %v651_v20, %v485_v61  ;;  %v463_v49 = vmul.f32 %v653_v10, %v462_v42  ;;  %vm469_vm5 = vmor %vm467_vm4, %vm468_vm3 }
 0x1c3   :  { %567 = vst.msk [vmem:[%s1192_s5 + $0xc] sm:$0xf] %vm563_vm9, %v550_v4  ;;  %v498_v23 = vmul.f32 %v410_v45, %v938_v35 }
 0x1c4   :  { %v561_v57 = vpack.c.bf16 %v545_v36, %v545_v36  ;;  %v490_v46 = vsel %vm489_vm2, %v651_v20, %v486_v37  ;;  %v464_v24 = vmul.f32 0.5, %v463_v49 }
 0x1c5   :  { %v518_v54 = vmul.f32 %v972_v21, %v498_v23  ;;  %v506_v55 = vmul.f32 %v490_v46, %v930_v29 }
 0x1c6   :  { %578 = vst.msk [vmem:[%s1192_s5 + $0x38] sm:$0xf] %vm563_vm9, %v561_v57  ;;  %v465_v53 = vsub.f32 1.5, %v464_v24 }
 0x1c7   :  { %v538_v28 = vadd.f32 %v980_v31, %v518_v54  ;;  %v526_v48 = vmul.f32 %v972_v21, %v506_v55 }
 0x1c8   :  { %v466_v56 = vmul.f32 %v653_v10, %v465_v53 }
 0x1c9   :  { %v554_v47 = vpack.c.bf16 %v538_v28, %v538_v28  ;;  %v546_v63 = vadd.f32 %v980_v31, %v526_v48 }
 0x1ca   :  { %v470_v35 = vsel %vm469_vm5, %v653_v10, %v466_v56 }
 0x1cb   :  { %571 = vst.msk [vmem:[%s1192_s5 + $0x1c] sm:$0xf] %vm563_vm9, %v554_v47  ;;  %v562_v0 = vpack.c.bf16 %v546_v63, %v546_v63  ;;  %v504_v29 = vmul.f32 %v470_v35, %v945_v40 }
 0x1cd   :  { %579 = vst.msk [vmem:[%s1192_s5 + $0x3c] sm:$0xf] %vm563_vm9, %v562_v0  ;;  %v524_v11 = vmul.f32 %v972_v21, %v504_v29 }
 0x1cf   :  { %v544_v5 = vadd.f32 %v980_v31, %v524_v11 }
 0x1d1   :  { %v560_v58 = vpack.c.bf16 %v544_v5, %v544_v5 }
 0x1d3   :  { %577 = vst.msk [vmem:[%s1192_s5 + $0x34] sm:$0xf] %vm563_vm9, %v560_v58 }

</bundles_post_ra>
